<compile_context>
chip_gen: v5e
topology: v5e:2x2
jax: 0.10.0
libtpu: 0.0.40
codegen_flags: <defaults>
</compile_context>

<pallas_src>
import jax
import jax.numpy as jnp
from jax import lax
from jax.experimental import pallas as pl
from jax.experimental.pallas import tpu as pltpu

BN_EPS = 1e-5  # PyTorch BatchNorm2d default
_VMEM_LIMIT = 32 * 1024 * 1024


# ---------------------------------------------------------------------------
# pltpu.roll direction probe (run once, outside any trace).  We only rely on a
# sublane rotation; the probe pins down the sign convention so the conv kernels
# are correct regardless of the lowering's roll direction.
# ---------------------------------------------------------------------------
def _detect_roll_sign():
    def k(x_ref, o_ref):
        o_ref[...] = pltpu.roll(x_ref[...], shift=1, axis=0)

    x = jnp.tile(jnp.arange(8, dtype=jnp.float32).reshape(8, 1), (1, 128))
    out = pl.pallas_call(k, out_shape=jax.ShapeDtypeStruct((8, 128), jnp.float32))(x)
    # jnp.roll semantics: out[1] == x[0] == 0
    return 1 if float(out[1, 0]) == 0.0 else -1


# ---------------------------------------------------------------------------
# Fused direct 3x3 stride-1 conv kernel
#   prologue: optional BN(eval)+ReLU on the input (f32)
#   body    : 9 taps = sublane roll + mask + bf16 matmul, f32 accumulator
#   epilogue: bias, optional residual add, optional BN(eval)+ReLU (f32)
# ---------------------------------------------------------------------------
def _make_conv3x3_kernel(H, W, Cin, Cout, has_pre, has_post, has_res, roll_sign):
    M = H * W

    def kernel(*refs):
        it = iter(refs)
        x_ref = next(it)                       # (1, H, W, Cin)   f32
        w_ref = next(it)                       # (9, Cin, Cout)   bf16
        b_ref = next(it)                       # (1, Cout)        f32
        pre = [next(it) for _ in range(4)] if has_pre else None    # (1, Cin)
        post = [next(it) for _ in range(4)] if has_post else None  # (1, Cout)
        r_ref = next(it) if has_res else None  # (1, H, W, Cout)  f32
        o_ref = next(it)                       # (1, H, W, Cout)  f32

        x = x_ref[0].astype(jnp.float32)       # (H, W, Cin)
        if has_pre:                            # eval-mode BN + ReLU (f32, VPU)
            g, be, mu, var = (p[...] for p in pre)
            sc = g * lax.rsqrt(var + BN_EPS)
            x = jnp.maximum(x * sc + (be - mu * sc), 0.0)

        a2 = x.reshape(M, Cin)                 # flattened rows (W % 8 == 0 -> cheap)

        ho = lax.broadcasted_iota(jnp.int32, (H, W, 1), 0).reshape(M, 1)
        wo = lax.broadcasted_iota(jnp.int32, (H, W, 1), 1).reshape(M, 1)

        acc = jnp.zeros((M, Cout), jnp.float32)
        for i in range(3):
            for j in range(3):
                di, dj = i - 1, j - 1
                off = di * W + dj              # shift in flattened rows
                if off == 0:
                    slab = a2.astype(jnp.bfloat16)
                else:
                    shifted = pltpu.roll(a2, shift=((-off) * roll_sign) % M, axis=0)
                    valid = ((ho + di >= 0) & (ho + di < H) &
                             (wo + dj >= 0) & (wo + dj < W))
                    slab = jnp.where(valid, shifted, 0.0).astype(jnp.bfloat16)
                acc = acc + jnp.dot(slab, w_ref[i * 3 + j],
                                    preferred_element_type=jnp.float32)

        acc = acc + b_ref[...]
        if has_res:
            acc = acc + r_ref[0].reshape(M, Cout)
        if has_post:                           # fused consumer-side BN + ReLU
            g, be, mu, var = (p[...] for p in post)
            sc = g * lax.rsqrt(var + BN_EPS)
            acc = jnp.maximum(acc * sc + (be - mu * sc), 0.0)
        o_ref[0] = acc.reshape(H, W, Cout).astype(o_ref.dtype)

    return kernel


def conv3x3_direct(x, w, b, roll_sign, pre_bn=None, post_bn=None, residual=None):
    """3x3 pad-1 stride-1 conv, fused BN/ReLU prologue+epilogue, fused residual."""
    N, H, W, Cin = x.shape
    Cout = w.shape[3]
    w9 = w.reshape(9, Cin, Cout).astype(jnp.bfloat16)
    b2 = b.reshape(1, Cout).astype(jnp.float32)

    args = [x, w9, b2]
    in_specs = [
        pl.BlockSpec((1, H, W, Cin), lambda n: (n, 0, 0, 0)),
        pl.BlockSpec((9, Cin, Cout), lambda n: (0, 0, 0)),
        pl.BlockSpec((1, Cout), lambda n: (0, 0)),
    ]

    def add_bn(bn, C):
        for name in ("gamma", "beta", "mean", "var"):
            args.append(bn[name].reshape(1, C).astype(jnp.float32))
            in_specs.append(pl.BlockSpec((1, C), lambda n: (0, 0)))

    has_pre, has_post = pre_bn is not None, post_bn is not None
    if has_pre:
        add_bn(pre_bn, Cin)
    if has_post:
        add_bn(post_bn, Cout)
    has_res = residual is not None
    if has_res:
        args.append(residual)
        in_specs.append(pl.BlockSpec((1, H, W, Cout), lambda n: (n, 0, 0, 0)))

    kernel = _make_conv3x3_kernel(H, W, Cin, Cout, has_pre, has_post, has_res,
                                  roll_sign)
    return pl.pallas_call(
        kernel,
        out_shape=jax.ShapeDtypeStruct((N, H, W, Cout), jnp.float32),
        grid=(N,),
        in_specs=in_specs,
        out_specs=pl.BlockSpec((1, H, W, Cout), lambda n: (n, 0, 0, 0)),
        compiler_params=pltpu.CompilerParams(
            dimension_semantics=("parallel",),
            vmem_limit_bytes=_VMEM_LIMIT),
    )(*args)


# ---------------------------------------------------------------------------
# bf16 GEMM kernel (bias + optional residual fused) -- used by the two stride-2
# 3x3 convs (small JAX-side im2col) and the 1x1 shortcut convs.
# ---------------------------------------------------------------------------
def _gemm_bias_kernel(x_ref, w_ref, b_ref, o_ref):
    acc = jnp.dot(x_ref[...], w_ref[...], preferred_element_type=jnp.float32)
    o_ref[...] = (acc + b_ref[...]).astype(o_ref.dtype)


def _gemm_bias_res_kernel(x_ref, w_ref, b_ref, r_ref, o_ref):
    acc = jnp.dot(x_ref[...], w_ref[...], preferred_element_type=jnp.float32)
    o_ref[...] = (acc + b_ref[...] + r_ref[...]).astype(o_ref.dtype)


def matmul_bias(x, w, b, res=None):
    """out = x @ w + b (+ res).  x:(M,K) bf16, w:(K,N) bf16, b:(N,) f32."""
    M, K = x.shape
    N = w.shape[1]
    tm = M
    if M % 16 == 0:                       # >=2 parallel grid steps (v7x megacore)
        tm = M // 2
        while tm > 512 and tm % 16 == 0:
            tm //= 2
    b2 = b.reshape(1, N).astype(jnp.float32)

    in_specs = [pl.BlockSpec((tm, K), lambda i: (i, 0)),
                pl.BlockSpec((K, N), lambda i: (0, 0)),
                pl.BlockSpec((1, N), lambda i: (0, 0))]
    args = [x, w, b2]
    if res is not None:
        in_specs.append(pl.BlockSpec((tm, N), lambda i: (i, 0)))
        args.append(res.astype(jnp.float32))
        kernel = _gemm_bias_res_kernel
    else:
        kernel = _gemm_bias_kernel

    return pl.pallas_call(
        kernel,
        out_shape=jax.ShapeDtypeStruct((M, N), jnp.float32),
        grid=(M // tm,),
        in_specs=in_specs,
        out_specs=pl.BlockSpec((tm, N), lambda i: (i, 0)),
        compiler_params=pltpu.CompilerParams(
            dimension_semantics=("parallel",),
            vmem_limit_bytes=_VMEM_LIMIT),
    )(*args)


def _im2col(x, k, stride, pad):
    """Small JAX-side patch builder (only used by the 2 tiny stride-2 convs)."""
    N, H, W, C = x.shape
    xp = jnp.pad(x, ((0, 0), (pad, pad), (pad, pad), (0, 0)))
    Ho = (H + 2 * pad - k) // stride + 1
    Wo = (W + 2 * pad - k) // stride + 1
    cols = [xp[:, i:i + stride * Ho:stride, j:j + stride * Wo:stride, :]
            for i in range(k) for j in range(k)]
    patches = jnp.concatenate(cols, axis=-1).reshape(N * Ho * Wo, k * k * C)
    return patches, Ho, Wo


def conv3x3_s2_gemm(h2, w, b, residual):
    """3x3 pad-1 stride-2 conv of the (already activated) h2, + bias + residual."""
    N, H, W, C = h2.shape
    Cout = w.shape[3]
    patches, Ho, Wo = _im2col(h2, 3, 2, 1)
    out = matmul_bias(patches.astype(jnp.bfloat16),
                      w.reshape(9 * C, Cout).astype(jnp.bfloat16),
                      b,
                      res=residual.reshape(N * Ho * Wo, Cout))
    return out.reshape(N, Ho, Wo, Cout)


def shortcut_1x1(x, w, b, stride):
    """1x1 conv (bias=True) shortcut; stride handled by subsampling."""
    N, H, W, Cin = x.shape
    Cout = w.shape[3]
    xs = x[:, ::stride, ::stride, :] if stride > 1 else x
    Ho, Wo = xs.shape[1], xs.shape[2]
    out = matmul_bias(xs.reshape(N * Ho * Wo, Cin).astype(jnp.bfloat16),
                      w.reshape(Cin, Cout).astype(jnp.bfloat16), b)
    return out.reshape(N, Ho, Wo, Cout)


# ---------------------------------------------------------------------------
# Head kernel: relu(bn1(x)) -> avg_pool2d(x, 8) (global mean on 8x8) -> Linear
# ---------------------------------------------------------------------------
def _head_kernel(x_ref, g_ref, b_ref, m_ref, v_ref, wl_ref, bl_ref, o_ref):
    Nb, H, W, C = x_ref.shape
    x = x_ref[...].astype(jnp.float32)
    sc = g_ref[...] * lax.rsqrt(v_ref[...] + BN_EPS)
    a = jnp.maximum(x * sc + (b_ref[...] - m_ref[...] * sc), 0.0)
    pooled = jnp.mean(a.reshape(Nb, H * W, C), axis=1)          # (Nb, C) f32
    logits = jnp.dot(pooled.astype(jnp.bfloat16), wl_ref[...],
                     preferred_element_type=jnp.float32) + bl_ref[...]
    o_ref[...] = logits.astype(o_ref.dtype)


def head_forward(x, bn, wl, bl):
    N, H, W, C = x.shape
    ncls = wl.shape[1]
    g = bn["gamma"].reshape(1, C).astype(jnp.float32)
    be = bn["beta"].reshape(1, C).astype(jnp.float32)
    mu = bn["mean"].reshape(1, C).astype(jnp.float32)
    var = bn["var"].reshape(1, C).astype(jnp.float32)
    wlb = wl.astype(jnp.bfloat16)
    bl2 = bl.reshape(1, ncls).astype(jnp.float32)

    def fs(shape):
        return pl.BlockSpec(shape, lambda i, _n=len(shape): (0,) * _n)

    return pl.pallas_call(
        _head_kernel,
        out_shape=jax.ShapeDtypeStruct((N, ncls), jnp.float32),
        grid=(1,),
        in_specs=[fs((N, H, W, C)), fs((1, C)), fs((1, C)), fs((1, C)), fs((1, C)),
                  fs((C, ncls)), fs((1, ncls))],
        out_specs=fs((N, ncls)),
        compiler_params=pltpu.CompilerParams(
            dimension_semantics=("arbitrary",),
            vmem_limit_bytes=_VMEM_LIMIT),
    )(x, g, be, mu, var, wlb, bl2)


# ---------------------------------------------------------------------------
# Parameter init (deterministic, PyTorch-like uniform bounds) + static config
# ---------------------------------------------------------------------------
def _init_conv(key, kh, kw, cin, cout):
    k1, k2 = jax.random.split(key)
    bound = 1.0 / float(kh * kw * cin) ** 0.5
    w = jax.random.uniform(k1, (kh, kw, cin, cout), jnp.float32, -bound, bound)
    b = jax.random.uniform(k2, (cout,), jnp.float32, -bound, bound)
    return w, b


def _init_bn(key, c):
    k1, k2, k3, k4 = jax.random.split(key, 4)
    return dict(
        gamma=1.0 + 0.1 * jax.random.normal(k1, (c,), jnp.float32),
        beta=0.1 * jax.random.normal(k2, (c,), jnp.float32),
        mean=0.1 * jax.random.normal(k3, (c,), jnp.float32),
        var=jax.random.uniform(k4, (c,), jnp.float32, 0.5, 1.5),
    )


def init_model(key, depth=10, widen_factor=1, num_classes=10, input_ch=3):
    assert (depth - 4) % 6 == 0
    n = (depth - 4) // 6
    k = widen_factor
    nStages = [16, 16 * k, 32 * k, 64 * k]      # adapted=False
    keys = iter(jax.random.split(key, 128))

    params = {"conv1": _init_conv(next(keys), 3, 3, input_ch, nStages[0])}
    layers, cfg = [], []
    in_planes = nStages[0]
    for planes, stride0 in ((nStages[1], 1), (nStages[2], 2), (nStages[3], 2)):
        for s in [stride0] + [1] * (n - 1):
            has_sc = (s != 1 or in_planes != planes)
            blk = {"bn_pre1": _init_bn(next(keys), in_planes),
                   "conv_a": _init_conv(next(keys), 3, 3, in_planes, planes),
                   "bn_pre2": _init_bn(next(keys), planes),
                   "conv_b": _init_conv(next(keys), 3, 3, planes, planes),
                   "shortcut": _init_conv(next(keys), 1, 1, in_planes, planes) if has_sc else None}
            layers.append(blk)
            cfg.append({"stride": s, "has_shortcut": has_sc})
            in_planes = planes
    params["layers"] = layers
    params["bn1"] = _init_bn(next(keys), nStages[3])
    kw_, kb_ = jax.random.split(next(keys))
    bound = 1.0 / float(nStages[3]) ** 0.5
    params["linear"] = (
        jax.random.uniform(kw_, (nStages[3], num_classes), jnp.float32, -bound, bound),
        jax.random.uniform(kb_, (num_classes,), jnp.float32, -bound, bound))
    return params, cfg


# ---------------------------------------------------------------------------
# Forward pass (matches WideResNet.forward / WideBasic.forward, eval mode)
# ---------------------------------------------------------------------------
def make_forward(cfg, roll_sign):
    def wide_basic(c, blk, x):
        wa, ba = blk["conv_a"]
        # conv_a: pre-act bn_pre1+ReLU (prologue), 3x3 s1 conv + bias, and the
        # NEXT conv's pre-activation (bn_pre2+ReLU) fused as the epilogue.
        # (nn.Dropout between conv_a and conv_b is identity at inference.)
        h2 = conv3x3_direct(x, wa, ba, roll_sign,
                            pre_bn=blk["bn_pre1"], post_bn=blk["bn_pre2"])
        if c["has_shortcut"]:
            ws, bs = blk["shortcut"]
            sc = shortcut_1x1(x, ws, bs, c["stride"])
        else:
            sc = x
        wb, bb = blk["conv_b"]
        if c["stride"] == 1:
            return conv3x3_direct(h2, wb, bb, roll_sign, residual=sc)
        return conv3x3_s2_gemm(h2, wb, bb, sc)

    def forward(params, x_nchw, y=None, y_onehot=None):
        # layout: transpose NCHW (PyTorch) -> NHWC once; all kernels run NHWC.
        x = jnp.transpose(x_nchw, (0, 2, 3, 1)).astype(jnp.float32)
        loss = jnp.float32(0.0)   # local losses are 0.0 in inference mode
        w1, b1 = params["conv1"]
        x = conv3x3_direct(x, w1, b1, roll_sign)          # stem: raw conv (post_act=False)
        for c, blk in zip(cfg, params["layers"]):
            x = wide_basic(c, blk, x)
        logits = head_forward(x, params["bn1"], *params["linear"])
        return logits, loss

    return forward


# ---------------------------------------------------------------------------
# Pure-JAX reference (bf16 MXU operands, f32 accumulation -- mirrors kernels)
# ---------------------------------------------------------------------------
def _ref_bn_relu(x, p):
    sc = p["gamma"] * lax.rsqrt(p["var"] + BN_EPS)
    return jnp.maximum(x * sc + (p["beta"] - p["mean"] * sc), 0.0)


def _ref_conv(x, w, b, stride, pad):
    out = lax.conv_general_dilated(
        x.astype(jnp.bfloat16), w.astype(jnp.bfloat16),
        (stride, stride), [(pad, pad), (pad, pad)],
        dimension_numbers=("NHWC", "HWIO", "NHWC"),
        preferred_element_type=jnp.float32)
    return out + b


def ref_forward(params, cfg, x_nchw):
    x = jnp.transpose(x_nchw, (0, 2, 3, 1)).astype(jnp.float32)
    w1, b1 = params["conv1"]
    x = _ref_conv(x, w1, b1, 1, 1)
    for c, blk in zip(cfg, params["layers"]):
        a = _ref_bn_relu(x, blk["bn_pre1"])
        wa, ba = blk["conv_a"]
        h = _ref_conv(a, wa, ba, 1, 1)
        h2 = _ref_bn_relu(h, blk["bn_pre2"])
        if c["has_shortcut"]:
            ws, bs = blk["shortcut"]
            sc = _ref_conv(x, ws, bs, c["stride"], 0)
        else:
            sc = x
        wb, bb = blk["conv_b"]
        x = _ref_conv(h2, wb, bb, c["stride"], 1) + sc
    x = _ref_bn_relu(x, params["bn1"])
    pooled = jnp.mean(x, axis=(1, 2))
    Wl, bl = params["linear"]
    return jnp.dot(pooled.astype(jnp.bfloat16), Wl.astype(jnp.bfloat16),
                   preferred_element_type=jnp.float32) + bl


# ---------------------------------------------------------------------------
if __name__ == "__main__":
    key = jax.random.PRNGKey(0)
    kp, kx = jax.random.split(key)

    # Wide-ResNet 10x1 (depth=10 -> n=1), 10 classes, CIFAR-like 32x32 RGB input
    # (the module's avg_pool2d(x, 8) head implies a 32x32 input).
    batch, input_ch, input_dim, num_classes = 2, 3, 32, 10
    params, cfg = init_model(kp, depth=10, widen_factor=1,
                             num_classes=num_classes, input_ch=input_ch)

    x = jax.random.normal(kx, (batch, input_ch, input_dim, input_dim), jnp.float32)
    y = jnp.zeros((batch,), jnp.int32)                        # unused at inference
    y_onehot = jnp.zeros((batch, num_classes), jnp.float32)   # unused at inference

    roll_sign = _detect_roll_sign()          # must run before jit tracing
    forward = jax.jit(make_forward(cfg, roll_sign))

    logits, loss = forward(params, x, y, y_onehot)
    jax.block_until_ready(logits)

    ref = ref_forward(params, cfg, x)
    assert logits.shape == (batch, num_classes)
    max_err = float(jnp.max(jnp.abs(logits - ref)))
    assert jnp.allclose(logits, ref, atol=2e-3, rtol=2e-3), (max_err, logits, ref)

    print("KERNEL_OK")
</pallas_src>

<mosaic_0001>
module attributes {stable_mosaic.version = 11 : i64} {
  func.func @k(%arg0: memref<8x128xf32, #tpu.memory_space<vmem>>, %arg1: memref<8x128xf32, #tpu.memory_space<vmem>>) attributes {dimension_semantics = [], scalar_prefetch = 0 : i64, scratch_operands = 0 : i64, tpu.core_type = #tpu.core_type<tc>} {
    %c0 = arith.constant 0 : index
    %c0_0 = arith.constant 0 : index
    %0 = vector.load %arg0[%c0, %c0_0] : memref<8x128xf32, #tpu.memory_space<vmem>>, vector<8x128xf32>
    %c1_i32 = arith.constant 1 : i32
    %1 = tpu.dynamic_rotate %0 by %c1_i32 dim 0 : vector<8x128xf32>, i32 -> vector<8x128xf32>
    %c0_1 = arith.constant 0 : index
    %c0_2 = arith.constant 0 : index
    %2 = vector.load %arg1[%c0_1, %c0_2] : memref<8x128xf32, #tpu.memory_space<vmem>>, vector<8x128xf32>
    tpu.vector_store %arg1[%c0_1, %c0_2], %1 {strides = array<i32>} : memref<8x128xf32, #tpu.memory_space<vmem>>, vector<8x128xf32>,
    return
  }
}

</mosaic_0001>

<bundles_post_ra>
// kernel: tpu_custom_call.1
= control target key start
LH: loop header
LB: loop body
LE: loop exit
PB: predicated region body
PF: predicated region fallthrough
CT: control target
= control target key end

     0   :  { %6 = vsyncpa [#allocation3], 0  ;;  %s115_s0 = inlined_call_operand.hbm [shape: f32[8,128], index: 0, kind: input, shape index: {}]   ;;  %s116_s1 = inlined_call_operand.hbm [shape: f32[8,128], index: 1, kind: output, shape index: {}]  }
   0x1   :  { %7 = vsyncpa [#allocation4], 0  ;;  %s13_s8 = sshll.u32 %s115_s0, 4  ;;  %s97_s9 = smov [#allocation2]   ;;  %s14_s8 = int_to_ptr.hbm [resolvable:$true] %s13_s8 }
   0x2   :  { %s15_s10 = sshll.u32 %s97_s9, 4  ;;  %s16_s10 = int_to_ptr.vmem [resolvable:$true] %s15_s10 }
   0x3   :  { %18 = dma.hbm_to_vmem [thread:$0]  %s14_s8, 128, %s16_s10, [#allocation3]  }
   0x4   :  { %93 = dma.done.wait [#allocation3], 128  }
   0x5   :  { %94 = vsyncadd [#allocation3], 4294967168  ;;  %s98_s11 = smov [#allocation5]   ;;  %s33_s15 = sshll.u32 %s116_s1, 4  ;;  %v23_v0 = vld [vmem:[#allocation2] sm:$0xff]  ;;  %s34_s15 = int_to_ptr.hbm [resolvable:$true] %s33_s15 }
   0x6   :  { %s31_s12 = sshll.u32 %s98_s11, 4  ;;  %v24_v1 = vrot.slane %v23_v0, 7  ;;  %s32_s12 = int_to_ptr.vmem [resolvable:$true] %s31_s12 }
   0x8   :  { %25 = vst [vmem:[#allocation5] sm:$0xff] %v24_v1 }
   0x9   :  { %36 = dma.vmem_to_hbm [thread:$0]  %s32_s12, 128, %s34_s15, [#allocation4]  }
   0xa   :  { %95 = dma.done.wait [#allocation4], 128  }
   0xb   :  { %96 = vsyncadd [#allocation4], 4294967168 }
   0xc   :  { %41 = vsyncpa [#allocation3], 1 }
   0xd   :  { %42 = vsyncpa [#allocation4], 1 }

</bundles_post_ra>
